<compile_context>
chip_gen: v5e
topology: v5e:2x2
jax: 0.10.0
libtpu: 0.0.40
codegen_flags: <defaults>
</compile_context>

<pallas_src>
import functools

import jax
import jax.numpy as jnp
from jax.experimental import pallas as pl
from jax.experimental.pallas import tpu as pltpu

_LANES = 128
_TARGET_TILE_ROWS = 8192  # 8192*128*4B = 4 MiB per f32 input block


def _to_sublanes(v, tile_rows):
    """(tile_rows, 128) -> (8, 128) partial sum using full-vreg VALU adds."""
    if tile_rows % 8 == 0:
        return v.reshape(tile_rows // 8, 8, _LANES).sum(axis=0)
    # Tiny-input fallback (tile_rows < 8 or not a multiple of 8): reduce to a
    # single row and place it in sublane 0 of an (8,128) block.
    s = jnp.sum(v, axis=0, keepdims=True)                       # (1, 128)
    rows = jax.lax.broadcasted_iota(jnp.int32, (8, _LANES), 0)
    return jnp.where(rows == 0, jnp.broadcast_to(s, (8, _LANES)), 0.0)


def _tsdice_kernel(x_ref, t_ref, out_ref, *, rows_full, tile_rows,
                   steps_per_core, needs_mask):
    """Per-core accumulation of the four partial sums.

    out_ref (VMEM block, f32[1, 4, 8, 128]) quantity index:
      0: bce_sum   1: intersection_sum   2: sigmoid_sum   3: target_sum
    """
    c = pl.program_id(0)   # core index ("parallel")
    i = pl.program_id(1)   # reduction step ("arbitrary")

    @pl.when(i == 0)
    def _init():
        out_ref[...] = jnp.zeros_like(out_ref)

    def accumulate(masked):
        x = x_ref[...].astype(jnp.float32)
        t = t_ref[...].astype(jnp.float32)

        if masked:
            g = c * steps_per_core + i
            valid = rows_full - g * tile_rows        # rows of this tile in range
            row_ids = jax.lax.broadcasted_iota(
                jnp.int32, (tile_rows, _LANES), 0)
            mask = row_ids < valid
            x = jnp.where(mask, x, 0.0)
            t = jnp.where(mask, t, 0.0)

        # Numerically-stable BCE-with-logits (matches torch.nn.BCEWithLogitsLoss):
        #   max(x, 0) - x*t + log(1 + exp(-|x|))
        # Reuse e = exp(-|x|) for the sigmoid as well (one fewer EUP op/element).
        e = jnp.exp(-jnp.abs(x))
        bce = jnp.maximum(x, 0.0) - x * t + jnp.log1p(e)
        p = jnp.where(x >= 0.0, 1.0, e) / (1.0 + e)   # sigmoid(x), stable
        dt = (t == 1.0).astype(jnp.float32)           # dice_target

        if masked:
            bce = jnp.where(mask, bce, 0.0)
            p = jnp.where(mask, p, 0.0)
            # dt is already 0 at masked positions (t forced to 0 there).

        out_ref[0, 0] += _to_sublanes(bce, tile_rows)
        out_ref[0, 1] += _to_sublanes(p * dt, tile_rows)
        out_ref[0, 2] += _to_sublanes(p, tile_rows)
        out_ref[0, 3] += _to_sublanes(dt, tile_rows)

    if needs_mask:
        g = c * steps_per_core + i
        tile_full = (g + 1) * tile_rows <= rows_full

        @pl.when(tile_full)
        def _full():
            accumulate(masked=False)

        @pl.when(jnp.logical_not(tile_full))
        def _ragged():
            accumulate(masked=True)
    else:
        accumulate(masked=False)


def _tail_partial_sums(x_tail, t_tail):
    """Pure-JAX partial sums for the <128-element lane tail (rare path)."""
    x = x_tail.astype(jnp.float32)
    t = t_tail.astype(jnp.float32)
    e = jnp.exp(-jnp.abs(x))
    bce = jnp.maximum(x, 0.0) - x * t + jnp.log1p(e)
    p = jnp.where(x >= 0.0, 1.0, e) / (1.0 + e)
    dt = (t == 1.0).astype(jnp.float32)
    return jnp.sum(bce), jnp.sum(p * dt), jnp.sum(p), jnp.sum(dt)


def tsdice_loss(outputs, targets):
    """Pallas implementation of TSDiceLoss.forward(outputs, targets) -> scalar.

    Inputs may be f32 or bf16 (bf16 halves HBM traffic; math is f32 in-kernel).
    """
    assert outputs.shape == targets.shape
    n_valid = outputs.size

    x = outputs.reshape(-1)
    t = targets.reshape(-1)

    rows_full = n_valid // _LANES
    rem = n_valid - rows_full * _LANES

    bce_sum = jnp.float32(0.0)
    inter_sum = jnp.float32(0.0)
    sig_sum = jnp.float32(0.0)
    tgt_sum = jnp.float32(0.0)

    if rows_full > 0:
        n_main = rows_full * _LANES
        if rem:
            # TODO(synk): prefix slice still costs one copy in the ragged case;
            # a fully copy-free ragged path needs a 1-D BlockSpec + flat mask.
            x_main = x[:n_main]
            t_main = t[:n_main]
        else:
            x_main = x
            t_main = t
        x2 = x_main.reshape(rows_full, _LANES)
        t2 = t_main.reshape(rows_full, _LANES)

        # Big lane-dense blocks for the mem-bound streaming reduction; full
        # extent block for small inputs (exempt from the (8,128) rule).
        tile_rows = rows_full if rows_full <= _TARGET_TILE_ROWS else _TARGET_TILE_ROWS
        total_tiles = -(-rows_full // tile_rows)

        # 2-TensorCore split (v7x); trivially a single core on v5e/v6e or when
        # there is only one tile.
        num_cores = 2 if total_tiles >= 2 else 1
        steps_per_core = -(-total_tiles // num_cores)
        padded_tiles = num_cores * steps_per_core - total_tiles
        needs_mask = (rows_full % tile_rows != 0) or (padded_tiles != 0)

        def in_map(c, i):
            g = c * steps_per_core + i
            if padded_tiles:
                g = jnp.minimum(g, total_tiles - 1)  # keep padded tiles in-bounds
            return (g, 0)

        kernel = functools.partial(
            _tsdice_kernel,
            rows_full=rows_full,
            tile_rows=tile_rows,
            steps_per_core=steps_per_core,
            needs_mask=needs_mask,
        )

        partials = pl.pallas_call(
            kernel,
            out_shape=jax.ShapeDtypeStruct((num_cores, 4, 8, _LANES), jnp.float32),
            grid_spec=pltpu.PrefetchScalarGridSpec(
                num_scalar_prefetch=0,
                grid=(num_cores, steps_per_core),
                in_specs=[
                    pl.BlockSpec((tile_rows, _LANES), in_map),
                    pl.BlockSpec((tile_rows, _LANES), in_map),
                ],
                out_specs=pl.BlockSpec((1, 4, 8, _LANES),
                                       lambda c, i: (c, 0, 0, 0)),
            ),
            compiler_params=pltpu.CompilerParams(
                dimension_semantics=("parallel", "arbitrary"),
                vmem_limit_bytes=40 << 20,
            ),
        )(x2, t2)

        sums = jnp.sum(partials, axis=(0, 2, 3))  # (4,)
        bce_sum = sums[0]
        inter_sum = sums[1]
        sig_sum = sums[2]
        tgt_sum = sums[3]

    if rem:
        tb, ti, ts, tt = _tail_partial_sums(x[rows_full * _LANES:],
                                            t[rows_full * _LANES:])
        bce_sum = bce_sum + tb
        inter_sum = inter_sum + ti
        sig_sum = sig_sum + ts
        tgt_sum = tgt_sum + tt

    eps = 1e-10
    bce_mean = bce_sum / jnp.float32(n_valid)
    intersection = inter_sum + eps
    union = sig_sum + tgt_sum + eps
    return bce_mean + 1.0 - jnp.log(2.0 * intersection / union)


def _tsdice_loss_ref(outputs, targets):
    """Pure-JAX reference for validation."""
    x = outputs.astype(jnp.float32)
    t = targets.astype(jnp.float32)
    bce = jnp.mean(jnp.maximum(x, 0.0) - x * t + jnp.log1p(jnp.exp(-jnp.abs(x))))
    eps = 1e-10
    dice_target = (t == 1.0).astype(jnp.float32)
    dice_output = jax.nn.sigmoid(x)
    intersection = jnp.sum(dice_output * dice_target) + eps
    union = jnp.sum(dice_output) + jnp.sum(dice_target) + eps
    return bce + 1.0 - jnp.log(2.0 * intersection / union)


if __name__ == "__main__":
    key = jax.random.PRNGKey(0)
    k1, k2 = jax.random.split(key)

    # Small shapes consistent with a segmentation-style loss: NCHW logits + binary targets.
    B, C, H, W = 2, 4, 16, 16
    outputs = jax.random.normal(k1, (B, C, H, W), dtype=jnp.float32)
    targets = jax.random.bernoulli(k2, 0.3, (B, C, H, W)).astype(jnp.float32)

    loss = jax.block_until_ready(tsdice_loss(outputs, targets))
    ref = jax.block_until_ready(_tsdice_loss_ref(outputs, targets))

    if not jnp.allclose(loss, ref, rtol=1e-5, atol=1e-5):
        raise AssertionError(f"mismatch: pallas={loss} ref={ref}")

    print("KERNEL_OK")
</pallas_src>

<mosaic_0001>
module attributes {stable_mosaic.version = 11 : i64} {
  func.func @_tsdice_kernel(%arg0: i32, %arg1: i32, %arg2: memref<16x128xf32, #tpu.memory_space<vmem>>, %arg3: memref<16x128xf32, #tpu.memory_space<vmem>>, %arg4: memref<1x4x8x128xf32, #tpu.memory_space<vmem>>) attributes {dimension_semantics = [#tpu.dimension_semantics<parallel>, #tpu.dimension_semantics<arbitrary>], iteration_bounds = array<i64: 1, 1>, scalar_prefetch = 0 : i64, scratch_operands = 0 : i64, tpu.core_type = #tpu.core_type<tc>, window_params = [{transform_indices = @transform_0, window_bounds = array<i64: 16, 128>}, {transform_indices = @transform_1, window_bounds = array<i64: 16, 128>}, {transform_indices = @transform_2, window_bounds = array<i64: 1, 4, 8, 128>}]} {
    %c0_i32 = arith.constant 0 : i32
    %0 = arith.cmpi eq, %arg1, %c0_i32 : i32
    %1 = arith.extui %0 : i1 to i32
    %c0_i32_0 = arith.constant 0 : i32
    %2 = arith.cmpi ne, %1, %c0_i32_0 : i32
    scf.if %2 {
      %cst_42 = arith.constant 0.000000e+00 : f32
      %59 = vector.broadcast %cst_42 : f32 to vector<1x4x8x128xf32>
      %c0_43 = arith.constant 0 : index
      %c0_44 = arith.constant 0 : index
      %c0_45 = arith.constant 0 : index
      %c0_46 = arith.constant 0 : index
      %60 = vector.load %arg4[%c0_43, %c0_44, %c0_45, %c0_46] : memref<1x4x8x128xf32, #tpu.memory_space<vmem>>, vector<1x4x8x128xf32>
      tpu.vector_store %arg4[%c0_43, %c0_44, %c0_45, %c0_46], %59 {strides = array<i32>} : memref<1x4x8x128xf32, #tpu.memory_space<vmem>>, vector<1x4x8x128xf32>,
    } else {
    }
    %c0 = arith.constant 0 : index
    %c0_1 = arith.constant 0 : index
    %3 = vector.load %arg2[%c0, %c0_1] : memref<16x128xf32, #tpu.memory_space<vmem>>, vector<16x128xf32>
    %c0_2 = arith.constant 0 : index
    %c0_3 = arith.constant 0 : index
    %4 = vector.load %arg3[%c0_2, %c0_3] : memref<16x128xf32, #tpu.memory_space<vmem>>, vector<16x128xf32>
    %5 = math.absf %3 : vector<16x128xf32>
    %cst = arith.constant 0.000000e+00 : f32
    %6 = vector.broadcast %cst : f32 to vector<16x128xf32>
    %7 = arith.subf %6, %5 : vector<16x128xf32>
    %8 = math.exp %7 : vector<16x128xf32>
    %cst_4 = arith.constant 0.000000e+00 : f32
    %9 = vector.broadcast %cst_4 : f32 to vector<16x128xf32>
    %10 = arith.maximumf %3, %9 : vector<16x128xf32>
    %11 = arith.mulf %3, %4 : vector<16x128xf32>
    %12 = arith.subf %10, %11 : vector<16x128xf32>
    %13 = math.log1p %8 : vector<16x128xf32>
    %14 = arith.addf %12, %13 : vector<16x128xf32>
    %cst_5 = arith.constant 0.000000e+00 : f32
    %15 = vector.broadcast %cst_5 : f32 to vector<16x128xf32>
    %16 = arith.cmpf oge, %3, %15 : vector<16x128xf32>
    %cst_6 = arith.constant 1.000000e+00 : f32
    %17 = vector.broadcast %cst_6 : f32 to vector<16x128xf32>
    %18 = arith.select %16, %17, %8 : vector<16x128xi1>, vector<16x128xf32>
    %cst_7 = arith.constant 1.000000e+00 : f32
    %19 = vector.broadcast %cst_7 : f32 to vector<16x128xf32>
    %20 = arith.addf %19, %8 : vector<16x128xf32>
    %21 = arith.divf %18, %20 : vector<16x128xf32>
    %cst_8 = arith.constant 1.000000e+00 : f32
    %22 = vector.broadcast %cst_8 : f32 to vector<16x128xf32>
    %23 = arith.cmpf oeq, %4, %22 : vector<16x128xf32>
    %24 = arith.extui %23 : vector<16x128xi1> to vector<16x128xi32>
    %25 = arith.sitofp %24 : vector<16x128xi32> to vector<16x128xf32>
    %c0_9 = arith.constant 0 : index
    %c0_10 = arith.constant 0 : index
    %c0_11 = arith.constant 0 : index
    %c0_12 = arith.constant 0 : index
    %26 = vector.load %arg4[%c0_9, %c0_10, %c0_11, %c0_12] : memref<1x4x8x128xf32, #tpu.memory_space<vmem>>, vector<1x1x8x128xf32>
    %27 = vector.shape_cast %26 : vector<1x1x8x128xf32> to vector<8x128xf32>
    %28 = vector.shape_cast %14 : vector<16x128xf32> to vector<2x8x128xf32>
    %cst_13 = arith.constant dense<0.000000e+00> : vector<8x128xf32>
    %29 = vector.multi_reduction <add>, %28, %cst_13 [0] : vector<2x8x128xf32> to vector<8x128xf32>
    %30 = arith.addf %27, %29 : vector<8x128xf32>
    %c0_14 = arith.constant 0 : index
    %c0_15 = arith.constant 0 : index
    %c0_16 = arith.constant 0 : index
    %c0_17 = arith.constant 0 : index
    %31 = vector.load %arg4[%c0_14, %c0_15, %c0_16, %c0_17] : memref<1x4x8x128xf32, #tpu.memory_space<vmem>>, vector<1x1x8x128xf32>
    %32 = vector.shape_cast %31 : vector<1x1x8x128xf32> to vector<8x128xf32>
    %33 = vector.shape_cast %30 : vector<8x128xf32> to vector<1x1x8x128xf32>
    tpu.vector_store %arg4[%c0_14, %c0_15, %c0_16, %c0_17], %33 {strides = array<i32>} : memref<1x4x8x128xf32, #tpu.memory_space<vmem>>, vector<1x1x8x128xf32>,
    %c0_18 = arith.constant 0 : index
    %c1 = arith.constant 1 : index
    %c0_19 = arith.constant 0 : index
    %c0_20 = arith.constant 0 : index
    %34 = vector.load %arg4[%c0_18, %c1, %c0_19, %c0_20] : memref<1x4x8x128xf32, #tpu.memory_space<vmem>>, vector<1x1x8x128xf32>
    %35 = vector.shape_cast %34 : vector<1x1x8x128xf32> to vector<8x128xf32>
    %36 = arith.mulf %21, %25 : vector<16x128xf32>
    %37 = vector.shape_cast %36 : vector<16x128xf32> to vector<2x8x128xf32>
    %cst_21 = arith.constant dense<0.000000e+00> : vector<8x128xf32>
    %38 = vector.multi_reduction <add>, %37, %cst_21 [0] : vector<2x8x128xf32> to vector<8x128xf32>
    %39 = arith.addf %35, %38 : vector<8x128xf32>
    %c0_22 = arith.constant 0 : index
    %c1_23 = arith.constant 1 : index
    %c0_24 = arith.constant 0 : index
    %c0_25 = arith.constant 0 : index
    %40 = vector.load %arg4[%c0_22, %c1_23, %c0_24, %c0_25] : memref<1x4x8x128xf32, #tpu.memory_space<vmem>>, vector<1x1x8x128xf32>
    %41 = vector.shape_cast %40 : vector<1x1x8x128xf32> to vector<8x128xf32>
    %42 = vector.shape_cast %39 : vector<8x128xf32> to vector<1x1x8x128xf32>
    tpu.vector_store %arg4[%c0_22, %c1_23, %c0_24, %c0_25], %42 {strides = array<i32>} : memref<1x4x8x128xf32, #tpu.memory_space<vmem>>, vector<1x1x8x128xf32>,
    %c0_26 = arith.constant 0 : index
    %c2 = arith.constant 2 : index
    %c0_27 = arith.constant 0 : index
    %c0_28 = arith.constant 0 : index
    %43 = vector.load %arg4[%c0_26, %c2, %c0_27, %c0_28] : memref<1x4x8x128xf32, #tpu.memory_space<vmem>>, vector<1x1x8x128xf32>
    %44 = vector.shape_cast %43 : vector<1x1x8x128xf32> to vector<8x128xf32>
    %45 = vector.shape_cast %21 : vector<16x128xf32> to vector<2x8x128xf32>
    %cst_29 = arith.constant dense<0.000000e+00> : vector<8x128xf32>
    %46 = vector.multi_reduction <add>, %45, %cst_29 [0] : vector<2x8x128xf32> to vector<8x128xf32>
    %47 = arith.addf %44, %46 : vector<8x128xf32>
    %c0_30 = arith.constant 0 : index
    %c2_31 = arith.constant 2 : index
    %c0_32 = arith.constant 0 : index
    %c0_33 = arith.constant 0 : index
    %48 = vector.load %arg4[%c0_30, %c2_31, %c0_32, %c0_33] : memref<1x4x8x128xf32, #tpu.memory_space<vmem>>, vector<1x1x8x128xf32>
    %49 = vector.shape_cast %48 : vector<1x1x8x128xf32> to vector<8x128xf32>
    %50 = vector.shape_cast %47 : vector<8x128xf32> to vector<1x1x8x128xf32>
    tpu.vector_store %arg4[%c0_30, %c2_31, %c0_32, %c0_33], %50 {strides = array<i32>} : memref<1x4x8x128xf32, #tpu.memory_space<vmem>>, vector<1x1x8x128xf32>,
    %c0_34 = arith.constant 0 : index
    %c3 = arith.constant 3 : index
    %c0_35 = arith.constant 0 : index
    %c0_36 = arith.constant 0 : index
    %51 = vector.load %arg4[%c0_34, %c3, %c0_35, %c0_36] : memref<1x4x8x128xf32, #tpu.memory_space<vmem>>, vector<1x1x8x128xf32>
    %52 = vector.shape_cast %51 : vector<1x1x8x128xf32> to vector<8x128xf32>
    %53 = vector.shape_cast %25 : vector<16x128xf32> to vector<2x8x128xf32>
    %cst_37 = arith.constant dense<0.000000e+00> : vector<8x128xf32>
    %54 = vector.multi_reduction <add>, %53, %cst_37 [0] : vector<2x8x128xf32> to vector<8x128xf32>
    %55 = arith.addf %52, %54 : vector<8x128xf32>
    %c0_38 = arith.constant 0 : index
    %c3_39 = arith.constant 3 : index
    %c0_40 = arith.constant 0 : index
    %c0_41 = arith.constant 0 : index
    %56 = vector.load %arg4[%c0_38, %c3_39, %c0_40, %c0_41] : memref<1x4x8x128xf32, #tpu.memory_space<vmem>>, vector<1x1x8x128xf32>
    %57 = vector.shape_cast %56 : vector<1x1x8x128xf32> to vector<8x128xf32>
    %58 = vector.shape_cast %55 : vector<8x128xf32> to vector<1x1x8x128xf32>
    tpu.vector_store %arg4[%c0_38, %c3_39, %c0_40, %c0_41], %58 {strides = array<i32>} : memref<1x4x8x128xf32, #tpu.memory_space<vmem>>, vector<1x1x8x128xf32>,
    return
  }
  func.func @transform_0(%arg0: i32, %arg1: i32) -> (i32, i32) {
    %c1_i32 = arith.constant 1 : i32
    %0 = arith.muli %arg0, %c1_i32 : i32
    %1 = arith.addi %0, %arg1 : i32
    %c0_i32 = arith.constant 0 : i32
    %c0_i32_0 = arith.constant 0 : i32
    return %1, %c0_i32 : i32, i32
  }
  func.func @transform_1(%arg0: i32, %arg1: i32) -> (i32, i32) {
    %c1_i32 = arith.constant 1 : i32
    %0 = arith.muli %arg0, %c1_i32 : i32
    %1 = arith.addi %0, %arg1 : i32
    %c0_i32 = arith.constant 0 : i32
    %c0_i32_0 = arith.constant 0 : i32
    return %1, %c0_i32 : i32, i32
  }
  func.func @transform_2(%arg0: i32, %arg1: i32) -> (i32, i32, i32, i32) {
    %c0_i32 = arith.constant 0 : i32
    %c0_i32_0 = arith.constant 0 : i32
    %c0_i32_1 = arith.constant 0 : i32
    %c0_i32_2 = arith.constant 0 : i32
    return %arg0, %c0_i32, %c0_i32_0, %c0_i32_1 : i32, i32, i32, i32
  }
}

</mosaic_0001>

<bundles_post_ra>
// kernel: tpu_custom_call.1
= control target key start
LH: loop header
LB: loop body
LE: loop exit
PB: predicated region body
PF: predicated region fallthrough
CT: control target
= control target key end

     0   :  { %7 = vsyncpa [#allocation3], 0  ;;  %s343_s0 = inlined_call_operand.hbm [shape: f32[16,128], index: 0, kind: input, shape index: {}]   ;;  %s344_s1 = inlined_call_operand.hbm [shape: f32[16,128], index: 1, kind: input, shape index: {}]   ;;  %s345_s2 = inlined_call_operand.hbm [shape: f32[1,4,8,128], index: 2, kind: output, shape index: {}]  }
   0x1   :  { %8 = vsyncpa [#allocation6], 0 }
   0x2   :  { %9 = vsyncpa [#allocation4], 0  ;;  %s18_s11 = sshll.u32 %s343_s0, 4  ;;  %s283_s12 = smov [#allocation2]   ;;  %s19_s11 = int_to_ptr.hbm [resolvable:$true] %s18_s11 }
   0x3   :  { %s20_s13 = sshll.u32 %s283_s12, 4  ;;  %s35_s16 = sshll.u32 %s344_s1, 4  ;;  %s21_s13 = int_to_ptr.vmem [resolvable:$true] %s20_s13  ;;  %s36_s16 = int_to_ptr.hbm [resolvable:$true] %s35_s16 }
   0x4   :  { %s284_s17 = smov 128   ;;  %s285_s18 = smov 8  }
   0x5   :  { %26 = dma.hbm_to_vmem [thread:$0]  %s19_s11, 256, %s21_s13, [#allocation3], %s284_s17, %s284_s17, %s285_s18  }
   0x6   :  { %s286_s19 = smov [#allocation5]  }
   0x7   :  { %s37_s20 = sshll.u32 %s286_s19, 4  ;;  %s38_s20 = int_to_ptr.vmem [resolvable:$true] %s37_s20 }
   0x8   :  { %43 = dma.hbm_to_vmem [thread:$0]  %s36_s16, 256, %s38_s20, [#allocation6], %s284_s17, %s284_s17, %s285_s18  }
   0x9   :  { %277 = dma.done.wait [#allocation3], 256  }
   0xa   :  { %278 = vsyncadd [#allocation3], 4294967040 }
   0xb   :  { %279 = dma.done.wait [#allocation6], 256  }
   0xc   :  { %280 = vsyncadd [#allocation6], 4294967040  ;;  %v316_v0 = vld [vmem:[#allocation2] sm:$0xff]  ;;  %v318_v1 = vld [vmem:[#allocation2 + $0x8] sm:$0xff]  ;;  %v287_v10 = vmov 0.0   ;;  %s288_s0 = smov [#allocation7]  }
   0xd   :  { %v68_v2 = vand.u32 2147483647, %v316_v0  ;;  %v69_v3 = vand.u32 2147483647, %v318_v1  ;;  %v66_v4 = vld [vmem:[#allocation5] sm:$0xff]  ;;  %v67_v5 = vld [vmem:[#allocation5 + $0x8] sm:$0xff] }
   0xe   :  { %vm138_vm0 = vcmp.eq.f32.partialorder %v66_v4, 1.0  ;;  %vm139_vm1 = vcmp.eq.f32.partialorder %v67_v5, 1.0  ;;  %v76_v20 = vmax.f32 %v316_v0, 0.0  ;;  %v78_v22 = vmul.f32 %v66_v4, %v316_v0  ;;  %s169_s1 = sshll.u32 %s288_s0, 4  ;;  %s171_s23 = sshll.u32 %s345_s2, 4  ;;  %s170_s1 = int_to_ptr.vmem [resolvable:$true] %s169_s1  ;;  %s172_s23 = int_to_ptr.hbm [resolvable:$true] %s171_s23 }
   0xf   :  { %v70_v6 = vsub.f32 0.0, %v68_v2  ;;  %v71_v7 = vsub.f32 0.0, %v69_v3  ;;  %v322_v11 = vsel %vm138_vm0, 1.0, %v287_v10  ;;  %v324_v12 = vsel %vm139_vm1, 1.0, %v287_v10 }
  0x10   :  { %v162_v13 = vadd.f32 %v324_v12, %v322_v11  ;;  %v77_v25 = vmax.f32 %v318_v1, 0.0  ;;  %v79_v26 = vmul.f32 %v67_v5, %v318_v1  ;;  %v80_v30 = vsub.f32 %v76_v20, %v78_v22 }
  0x11   :  { %v72_v8 = vmul.f32 1.442695, %v70_v6  ;;  %v74_v9 = vmul.f32 1.442695, %v71_v7  ;;  %vm102_vm8 = vcmp.ge.f32.partialorder %v316_v0, 0.0  ;;  %vm103_vm9 = vcmp.ge.f32.partialorder %v318_v1, 0.0 }
  0x12   :  { %164 = vst [vmem:[#allocation7 + $0x18] sm:$0xff] %v162_v13  ;;  %v81_v33 = vsub.f32 %v77_v25, %v79_v26 }
  0x13   :  { %193 = vpow2.f32 %v72_v8 }
  0x14   :  { %195 = vpow2.f32 %v74_v9 }
  0x19   :  { %v194_v14 = vpop.eup %193 }
  0x1a   :  { %v196_v15 = vpop.eup %195  ;;  %v82_v16 = vadd.f32 1.0, %v194_v14  ;;  %v85_v17 = vmul.f32 -0.5, %v194_v14  ;;  %v88_v23 = vand.u32 2147483647, %v194_v14  ;;  %v104_v56 = vsel %vm102_vm8, 1.0, %v194_v14 }
  0x1b   :  { %v91_v18 = vadd.f32 1.0, %v196_v15  ;;  %v94_v19 = vmul.f32 -0.5, %v196_v15  ;;  %v97_v27 = vand.u32 2147483647, %v196_v15  ;;  %v105_v58 = vsel %vm103_vm9, 1.0, %v196_v15 }
  0x1c   :  { %197 = vlog2.f32 %v82_v16  ;;  %v86_v21 = vadd.f32 1.0, %v85_v17  ;;  %vm89_vm2 = vcmp.lt.f32.partialorder %v88_v23, 0.0004427343  ;;  %vm113_vm4 = vweird.f32 %v82_v16 }
  0x1d   :  { %199 = vlog2.f32 %v91_v18  ;;  %v95_v24 = vadd.f32 1.0, %v94_v19  ;;  %vm98_vm3 = vcmp.lt.f32.partialorder %v97_v27, 0.0004427343  ;;  %v117_v40 = vand.u32 2147483647, %v82_v16 }
  0x1e   :  { %201 = vrcp.f32 %v82_v16  ;;  %v87_v28 = vmul.f32 %v194_v14, %v86_v21  ;;  %v119_v43 = vand.u32 2147483648, %v82_v16  ;;  %v134_v47 = vand.u32 2147483648, %v91_v18 }
  0x1f   :  { %203 = vrcp.f32 %v91_v18  ;;  %v96_v31 = vmul.f32 %v196_v15, %v95_v24  ;;  %vm128_vm6 = vweird.f32 %v91_v18  ;;  %v132_v49 = vand.u32 2147483647, %v91_v18 }
  0x20   :  { %v120_v52 = vor.u32 1.1754944e-38, %v119_v43  ;;  %vm118_vm11 = vcmp.eq.f32.partialorder %v117_v40, 8.507059e+37  ;;  %v135_v55 = vor.u32 1.1754944e-38, %v134_v47 }
  0x21   :  { %vm133_vm13 = vcmp.eq.f32.partialorder %v132_v49, 8.507059e+37 }
  0x22   :  { %v198_v29 = vpop.eup %197 }
  0x23   :  { %v200_v32 = vpop.eup %199  ;;  %v84_v34 = vmul.f32 0.6931472, %v198_v29 }
  0x24   :  { %v202_v35 = vpop.eup %201  ;;  %v93_v36 = vmul.f32 0.6931472, %v200_v32 }
  0x25   :  { %v204_v37 = vpop.eup %203  ;;  %v90_v38 = vsel %vm89_vm2, %v87_v28, %v84_v34  ;;  %v109_v39 = vmul.f32 %v202_v35, %v82_v16  ;;  %vm114_vm5 = vweird.f32 %v202_v35 }
  0x26   :  { %v99_v41 = vsel %vm98_vm3, %v96_v31, %v93_v36  ;;  %v100_v42 = vadd.f32 %v90_v38, %v80_v30  ;;  %v124_v44 = vmul.f32 %v204_v37, %v91_v18  ;;  %vm129_vm7 = vweird.f32 %v204_v37  ;;  %vm115_vm10 = vmor %vm113_vm4, %vm114_vm5 }
  0x27   :  { %v101_v45 = vadd.f32 %v99_v41, %v81_v33  ;;  %v110_v46 = vsub.f32 1.0, %v109_v39  ;;  %vm130_vm12 = vmor %vm128_vm6, %vm129_vm7 }
  0x28   :  { %v125_v48 = vsub.f32 1.0, %v124_v44 }
  0x29   :  { %v145_v50 = vadd.f32 %v101_v45, %v100_v42  ;;  %v111_v51 = vmul.f32 %v202_v35, %v110_v46 }
  0x2a   :  { %v126_v53 = vmul.f32 %v204_v37, %v125_v48 }
  0x2b   :  { %v112_v54 = vadd.f32 %v202_v35, %v111_v51  ;;  %147 = vst [vmem:[#allocation7] sm:$0xff] %v145_v50 }
  0x2c   :  { %v127_v57 = vadd.f32 %v204_v37, %v126_v53 }
  0x2d   :  { %v116_v59 = vsel %vm115_vm10, %v202_v35, %v112_v54 }
  0x2e   :  { %v121_v60 = vsel %vm118_vm11, %v120_v52, %v116_v59  ;;  %v131_v61 = vsel %vm130_vm12, %v204_v37, %v127_v57 }
  0x2f   :  { %v122_v62 = vmul.f32 %v121_v60, %v104_v56  ;;  %v136_v63 = vsel %vm133_vm13, %v135_v55, %v131_v61 }
  0x30   :  { %v137_v0 = vmul.f32 %v136_v63, %v105_v58 }
  0x31   :  { %v150_v1 = vmul.f32 %v322_v11, %v122_v62 }
  0x32   :  { %v151_v2 = vmul.f32 %v324_v12, %v137_v0  ;;  %v157_v3 = vadd.f32 %v137_v0, %v122_v62 }
  0x34   :  { %v152_v4 = vadd.f32 %v151_v2, %v150_v1  ;;  %159 = vst [vmem:[#allocation7 + $0x10] sm:$0xff] %v157_v3 }
  0x36   :  { %154 = vst [vmem:[#allocation7 + $0x8] sm:$0xff] %v152_v4 }
  0x37   :  { %177 = dma.vmem_to_hbm [thread:$0]  %s170_s1, 512, %s172_s23, [#allocation4], %s284_s17, %s284_s17, %s285_s18  }
  0x38   :  { %281 = dma.done.wait [#allocation4], 512  }
  0x39   :  { %282 = vsyncadd [#allocation4], 4294966784 }
  0x3a   :  { %182 = vsyncpa [#allocation3], 1 }
  0x3b   :  { %183 = vsyncpa [#allocation6], 1 }
  0x3c   :  { %184 = vsyncpa [#allocation4], 1 }

</bundles_post_ra>
